<compile_context>
chip_gen: v5e
topology: v5e:2x2
jax: 0.10.0
libtpu: 0.0.40
codegen_flags: <defaults>
</compile_context>

<pallas_src>
import functools

import jax
import jax.numpy as jnp
from jax.experimental import pallas as pl
from jax.experimental.pallas import tpu as pltpu


def _round_up(n, m):
    return ((n + m - 1) // m) * m


def _pick_tile(n, target, unit):
    """Largest multiple of `unit` <= target that divides n (n % unit == 0)."""
    t = max((min(target, n) // unit) * unit, unit)
    while n % t:
        t -= unit
    return t


# ---------------------------------------------------------------------------
# Kernel 1: tiled input projection, both directions
#   gates[d] = x @ W_ih[d] + (b_ih[d] + b_hh[d])      (W pre-transposed [K, G])
# ---------------------------------------------------------------------------
def _proj_kernel(x_ref, w_ref, b_ref, o_ref, acc_ref):
    k = pl.program_id(3)

    @pl.when(k == 0)
    def _():
        acc_ref[...] = jnp.zeros_like(acc_ref)

    # bf16 x bf16 -> f32 accumulate on the MXU.
    acc_ref[...] += jnp.dot(x_ref[...], w_ref[...],
                            preferred_element_type=jnp.float32)

    @pl.when(k == pl.num_programs(3) - 1)
    def _():
        o_ref[...] = (acc_ref[...] + b_ref[...]).astype(o_ref.dtype)


def _input_projection(x_rows, w_t, b, *, tm_target=512, tn_target=512, tk_target=512):
    """x_rows: [Mp, Kp] bf16;  w_t: [2, Kp, Gp] bf16;  b: [2, 1, Gp] f32.
    Returns gates [2, Mp, Gp] bf16."""
    Mp, Kp = x_rows.shape
    _, _, Gp = w_t.shape
    tm = _pick_tile(Mp, tm_target, 8)
    tn = _pick_tile(Gp, tn_target, 128)
    tk = _pick_tile(Kp, tk_target, 128)

    return pl.pallas_call(
        _proj_kernel,
        out_shape=jax.ShapeDtypeStruct((2, Mp, Gp), jnp.bfloat16),
        grid_spec=pltpu.PrefetchScalarGridSpec(
            num_scalar_prefetch=0,
            grid=(2, Mp // tm, Gp // tn, Kp // tk),
            in_specs=[
                pl.BlockSpec((tm, tk), lambda d, i, j, k: (i, k)),
                pl.BlockSpec((None, tk, tn), lambda d, i, j, k: (d, k, j)),
                pl.BlockSpec((None, 1, tn), lambda d, i, j, k: (d, 0, j)),
            ],
            out_specs=pl.BlockSpec((None, tm, tn), lambda d, i, j, k: (d, i, j)),
            scratch_shapes=[pltpu.VMEM((tm, tn), jnp.float32)],
        ),
        compiler_params=pltpu.CompilerParams(
            dimension_semantics=("parallel", "parallel", "parallel", "arbitrary"),
            vmem_limit_bytes=64 * 1024 * 1024),
    )(x_rows, w_t, b)


# ---------------------------------------------------------------------------
# Kernel 2: chunked bidirectional LSTM scan with length masking
#   grid step `ci`: forward timesteps [ci*TS, (ci+1)*TS), backward timesteps
#   [Tp-(ci+1)*TS, Tp-ci*TS) in decreasing order.  (h, c) per direction carried
#   in VMEM scratch.  Gate column order is [i, f, o, g] (pre-permuted weights).
# ---------------------------------------------------------------------------
def _bilstm_chunk_kernel(len_ref, gf_ref, gb_ref, whf_ref, whb_ref,
                         of_ref, ob_ref, hn_ref,
                         h_f, c_f, h_b, c_b, *, TS, Hd):
    ci = pl.program_id(0)
    nc = pl.num_programs(0)

    @pl.when(ci == 0)
    def _():
        h_f[...] = jnp.zeros_like(h_f)
        c_f[...] = jnp.zeros_like(c_f)
        h_b[...] = jnp.zeros_like(h_b)
        c_b[...] = jnp.zeros_like(c_b)

    lengths = len_ref[...]            # (Bp, 1) int32
    whf = whf_ref[...]                # (Hd, Gp) bf16
    whb = whb_ref[...]

    hf, cf = h_f[...], c_f[...]       # f32 carries
    hb, cb = h_b[...], c_b[...]

    def cell(gx, h, cst, w):
        # gx: (Bp, Gp) bf16 precomputed x-projection (+ both biases)
        rec = jnp.dot(h.astype(jnp.bfloat16), w,
                      preferred_element_type=jnp.float32)
        gates = gx.astype(jnp.float32) + rec
        s = jax.nn.sigmoid(gates[:, :3 * Hd])       # i | f | o
        g = jnp.tanh(gates[:, 3 * Hd:4 * Hd])       # g
        i_g = s[:, :Hd]
        f_g = s[:, Hd:2 * Hd]
        o_g = s[:, 2 * Hd:3 * Hd]
        c_new = f_g * cst + i_g * g
        h_new = o_g * jnp.tanh(c_new)
        return h_new, c_new

    for s_idx in range(TS):
        t_f = ci * TS + s_idx                       # forward global timestep
        l_b = TS - 1 - s_idx                        # backward local index
        t_b = (nc - 1 - ci) * TS + l_b              # backward global timestep

        valid_f = lengths > t_f
        valid_b = lengths > t_b

        # forward
        gx_f = gf_ref[:, pl.ds(s_idx, 1), :][:, 0, :]
        hf_new, cf_new = cell(gx_f, hf, cf, whf)
        hf = jnp.where(valid_f, hf_new, hf)
        cf = jnp.where(valid_f, cf_new, cf)
        of_ref[:, pl.ds(s_idx, 1), :] = (
            jnp.where(valid_f, hf, 0.0).astype(of_ref.dtype)[:, None, :])

        # backward
        gx_b = gb_ref[:, pl.ds(l_b, 1), :][:, 0, :]
        hb_new, cb_new = cell(gx_b, hb, cb, whb)
        hb = jnp.where(valid_b, hb_new, hb)
        cb = jnp.where(valid_b, cb_new, cb)
        ob_ref[:, pl.ds(l_b, 1), :] = (
            jnp.where(valid_b, hb, 0.0).astype(ob_ref.dtype)[:, None, :])

    h_f[...] = hf
    c_f[...] = cf
    h_b[...] = hb
    c_b[...] = cb

    # h_n only needs to be stored once, on the final chunk.
    @pl.when(ci == nc - 1)
    def _():
        hn_ref[0] = hf.astype(hn_ref.dtype)
        hn_ref[1] = hb.astype(hn_ref.dtype)


def _bilstm_scan(lens, gates, w_hh_f, w_hh_b, *, TS, Hd):
    """lens: [Bp, 1] i32; gates: [2, Bp, Tp, Gp] bf16; w_hh_*: [Hd, Gp] bf16."""
    _, Bp, Tp, Gp = gates.shape
    nc = Tp // TS
    kernel = functools.partial(_bilstm_chunk_kernel, TS=TS, Hd=Hd)
    return pl.pallas_call(
        kernel,
        out_shape=(
            jax.ShapeDtypeStruct((Bp, Tp, Hd), jnp.float32),   # forward outputs
            jax.ShapeDtypeStruct((Bp, Tp, Hd), jnp.float32),   # backward outputs
            jax.ShapeDtypeStruct((2, Bp, Hd), jnp.float32),    # h_n [fwd, bwd]
        ),
        grid_spec=pltpu.PrefetchScalarGridSpec(
            num_scalar_prefetch=0,
            grid=(nc,),
            in_specs=[
                pl.BlockSpec((Bp, 1), lambda c: (0, 0)),                         # lengths
                pl.BlockSpec((None, Bp, TS, Gp), lambda c: (0, 0, c, 0)),         # fwd gates
                pl.BlockSpec((None, Bp, TS, Gp), lambda c: (1, 0, nc - 1 - c, 0)),# bwd gates
                pl.BlockSpec((Hd, Gp), lambda c: (0, 0)),                         # W_hh fwd
                pl.BlockSpec((Hd, Gp), lambda c: (0, 0)),                         # W_hh bwd
            ],
            out_specs=(
                pl.BlockSpec((Bp, TS, Hd), lambda c: (0, c, 0)),
                pl.BlockSpec((Bp, TS, Hd), lambda c: (0, nc - 1 - c, 0)),
                pl.BlockSpec((2, Bp, Hd), lambda c: (0, 0, 0)),
            ),
            scratch_shapes=[pltpu.VMEM((Bp, Hd), jnp.float32)] * 4,
        ),
        compiler_params=pltpu.CompilerParams(
            dimension_semantics=("arbitrary",),
            vmem_limit_bytes=64 * 1024 * 1024),
    )(lens, gates, gates, w_hh_f, w_hh_b)


# ---------------------------------------------------------------------------
# RnnTemplate.forward (inference), bidirectional LSTM path
# ---------------------------------------------------------------------------
def rnn_template_forward(batchinput, batchlength, params, *,
                         residual=False, use_layernorm=False,
                         ln_weight=None, ln_bias=None, rnn_drop=0.0,
                         ts_target=16):
    """batchinput: [B, T, D], batchlength: [B] int.  Returns (output, hidden)."""
    B, T, D = batchinput.shape
    Hd = params["weight_hh_l0"].shape[1]          # per-direction hidden size
    H = 2 * Hd

    # torch.sort(descending=True); the module returns h_n in this sorted order
    # and never un-sorts it.  Outputs are handled with per-step length masks,
    # so sorting/gathering the inputs themselves is unnecessary.
    order = jnp.argsort(-batchlength)

    Bp = _round_up(B, 8)                          # sublane-align the batch
    TS = min(ts_target, _round_up(T, 8))          # timesteps per scan chunk
    Tp = _round_up(T, TS)
    Gp = _round_up(4 * Hd, 128)                   # lane-dense gate width
    Kp = _round_up(D, 128)

    # Gate order permuted [i, f, g, o] -> [i, f, o, g] so the cell runs one
    # wide sigmoid and one tanh.
    def permute_gates(w):
        return jnp.concatenate([w[:2 * Hd], w[3 * Hd:4 * Hd], w[2 * Hd:3 * Hd]],
                               axis=0)

    def prep_ih(name):                            # -> [Kp, Gp]
        w = permute_gates(params[name].astype(jnp.float32))       # [4Hd, D]
        return jnp.pad(w.T, ((0, Kp - D), (0, Gp - 4 * Hd)))

    def prep_bias(suffix):                        # folds b_ih + b_hh
        b = params["bias_ih_l0" + suffix] + params["bias_hh_l0" + suffix]
        b = permute_gates(b.astype(jnp.float32))
        return jnp.pad(b, ((0, Gp - 4 * Hd),))

    def prep_hh(name):                            # -> [Hd, Gp] bf16
        w = permute_gates(params[name].astype(jnp.float32))       # [4Hd, Hd]
        return jnp.pad(w.T, ((0, 0), (0, Gp - 4 * Hd))).astype(jnp.bfloat16)

    w_ih_t = jnp.stack([prep_ih("weight_ih_l0"),
                        prep_ih("weight_ih_l0_reverse")]).astype(jnp.bfloat16)
    b_all = jnp.stack([prep_bias(""), prep_bias("_reverse")]).reshape(2, 1, Gp)
    w_hh_f = prep_hh("weight_hh_l0")
    w_hh_b = prep_hh("weight_hh_l0_reverse")

    # Batch-major padded input, bf16, flattened to rows (no time transpose).
    x = jnp.pad(batchinput.astype(jnp.bfloat16),
                ((0, Bp - B), (0, Tp - T), (0, Kp - D)))
    x_rows = x.reshape(Bp * Tp, Kp)
    lens = jnp.pad(batchlength.astype(jnp.int32), ((0, Bp - B),)).reshape(Bp, 1)

    # All input->gate projections for both directions in one tiled matmul.
    gates = _input_projection(x_rows, w_ih_t, b_all)        # [2, Bp*Tp, Gp] bf16
    gates = gates.reshape(2, Bp, Tp, Gp)

    out_f, out_b, h_n = _bilstm_scan(lens, gates, w_hh_f, w_hh_b, TS=TS, Hd=Hd)

    out = jnp.concatenate([out_f, out_b], axis=-1)[:B, :T]   # [B, T, H]
    hidden = jnp.transpose(h_n[:, :B, :], (1, 0, 2))[order]  # [B, 2, Hd] (sorted)

    if residual:
        out = out + batchinput                                # requires H == D
    # nn.Dropout(rnn_drop) is identity at inference.
    # TODO(synk): training-mode stochastic dropout (pltpu.prng_*) not implemented.
    del rnn_drop
    if use_layernorm:
        w = jnp.ones((H,), jnp.float32) if ln_weight is None else ln_weight
        bln = jnp.zeros((H,), jnp.float32) if ln_bias is None else ln_bias
        mu = jnp.mean(out, axis=-1, keepdims=True)
        var = jnp.var(out, axis=-1, keepdims=True)
        out = (out - mu) * jax.lax.rsqrt(var + 1e-5) * w + bln
    # TODO(synk): ischar=True reshape path of RnnTemplate.forward not implemented.

    dtype = batchinput.dtype
    return out.astype(dtype), hidden.astype(dtype)


# ---------------------------------------------------------------------------
# Pure-JAX f32 reference with identical packed-sequence semantics
# ---------------------------------------------------------------------------
def _reference_bilstm(x, lengths, params, Hd):
    B, T, D = x.shape

    def run_dir(w_ih, w_hh, b_ih, b_hh, reverse):
        h = jnp.zeros((B, Hd), jnp.float32)
        c = jnp.zeros((B, Hd), jnp.float32)
        outs = [None] * T
        steps = range(T - 1, -1, -1) if reverse else range(T)
        for t in steps:
            gates = x[:, t] @ w_ih.T + b_ih + h @ w_hh.T + b_hh
            i, f, g, o = jnp.split(gates, 4, axis=-1)
            i = jax.nn.sigmoid(i)
            f = jax.nn.sigmoid(f)
            g = jnp.tanh(g)
            o = jax.nn.sigmoid(o)
            c_new = f * c + i * g
            h_new = o * jnp.tanh(c_new)
            valid = (lengths > t)[:, None]
            h = jnp.where(valid, h_new, h)
            c = jnp.where(valid, c_new, c)
            outs[t] = jnp.where(valid, h, 0.0)
        return jnp.stack(outs, axis=1), h

    out_f, hn_f = run_dir(params["weight_ih_l0"], params["weight_hh_l0"],
                          params["bias_ih_l0"], params["bias_hh_l0"], False)
    out_b, hn_b = run_dir(params["weight_ih_l0_reverse"], params["weight_hh_l0_reverse"],
                          params["bias_ih_l0_reverse"], params["bias_hh_l0_reverse"], True)
    return (jnp.concatenate([out_f, out_b], axis=-1),
            jnp.stack([hn_f, hn_b], axis=0))


def _xavier_uniform(key, shape, dtype=jnp.float32):
    fan_out, fan_in = shape
    limit = (6.0 / (fan_in + fan_out)) ** 0.5
    return jax.random.uniform(key, shape, dtype, -limit, limit)


if __name__ == "__main__":
    batch, seq, input_dim, hidden_dim = 4, 8, 32, 32
    Hd = hidden_dim // 2

    key = jax.random.PRNGKey(0)
    ks = jax.random.split(key, 5)

    # init_weight(): xavier_uniform_ weights, zero biases (PyTorch nn.LSTM layout)
    params = {
        "weight_ih_l0": _xavier_uniform(ks[0], (4 * Hd, input_dim)),
        "weight_hh_l0": _xavier_uniform(ks[1], (4 * Hd, Hd)),
        "bias_ih_l0": jnp.zeros((4 * Hd,), jnp.float32),
        "bias_hh_l0": jnp.zeros((4 * Hd,), jnp.float32),
        "weight_ih_l0_reverse": _xavier_uniform(ks[2], (4 * Hd, input_dim)),
        "weight_hh_l0_reverse": _xavier_uniform(ks[3], (4 * Hd, Hd)),
        "bias_ih_l0_reverse": jnp.zeros((4 * Hd,), jnp.float32),
        "bias_hh_l0_reverse": jnp.zeros((4 * Hd,), jnp.float32),
    }

    x = jax.random.normal(ks[4], (batch, seq, input_dim), jnp.float32)
    lengths = jnp.array([5, 8, 3, 8], jnp.int32)   # variable lengths, with ties

    out, hidden = rnn_template_forward(x, lengths, params)
    jax.block_until_ready(out)
    jax.block_until_ready(hidden)

    out_ref, hn_ref = _reference_bilstm(x, lengths, params, Hd)
    order = jnp.argsort(-lengths)
    hidden_ref = jnp.transpose(hn_ref, (1, 0, 2))[order]

    assert out.shape == (batch, seq, hidden_dim)
    assert hidden.shape == (batch, 2, Hd)
    # bf16 MXU operands + bf16 gate storage vs. f32 reference -> looser tolerance.
    assert jnp.allclose(out, out_ref, atol=3e-2, rtol=3e-2), \
        float(jnp.max(jnp.abs(out - out_ref)))
    assert jnp.allclose(hidden, hidden_ref, atol=3e-2, rtol=3e-2), \
        float(jnp.max(jnp.abs(hidden - hidden_ref)))

    print("KERNEL_OK")
</pallas_src>

<mosaic_0001>
module attributes {stable_mosaic.version = 11 : i64} {
  func.func @_proj_kernel(%arg0: i32, %arg1: i32, %arg2: i32, %arg3: i32, %arg4: memref<64x128xbf16, #tpu.memory_space<vmem>>, %arg5: memref<1x128x128xbf16, #tpu.memory_space<vmem>>, %arg6: memref<1x1x128xf32, #tpu.memory_space<vmem>>, %arg7: memref<1x64x128xbf16, #tpu.memory_space<vmem>>, %arg8: memref<64x128xf32, #tpu.memory_space<vmem>>) attributes {dimension_semantics = [#tpu.dimension_semantics<parallel>, #tpu.dimension_semantics<parallel>, #tpu.dimension_semantics<parallel>, #tpu.dimension_semantics<arbitrary>], iteration_bounds = array<i64: 2, 1, 1, 1>, scalar_prefetch = 0 : i64, scratch_operands = 1 : i64, tpu.core_type = #tpu.core_type<tc>, window_params = [{transform_indices = @transform_0, window_bounds = array<i64: 64, 128>}, {transform_indices = @transform_1, window_bounds = array<i64: 1, 128, 128>}, {transform_indices = @transform_2, window_bounds = array<i64: 1, 1, 128>}, {transform_indices = @transform_3, window_bounds = array<i64: 1, 64, 128>}]} {
    %c0_i32 = arith.constant 0 : i32
    %0 = arith.cmpi eq, %arg3, %c0_i32 : i32
    %1 = arith.extui %0 : i1 to i32
    %c0_i32_0 = arith.constant 0 : i32
    %2 = arith.cmpi ne, %1, %c0_i32_0 : i32
    scf.if %2 {
      %cst_11 = arith.constant 0.000000e+00 : f32
      %13 = vector.broadcast %cst_11 : f32 to vector<64x128xf32>
      %c0_12 = arith.constant 0 : index
      %c0_13 = arith.constant 0 : index
      %14 = vector.load %arg8[%c0_12, %c0_13] : memref<64x128xf32, #tpu.memory_space<vmem>>, vector<64x128xf32>
      tpu.vector_store %arg8[%c0_12, %c0_13], %13 {strides = array<i32>} : memref<64x128xf32, #tpu.memory_space<vmem>>, vector<64x128xf32>,
    } else {
    }
    %c0 = arith.constant 0 : index
    %c0_1 = arith.constant 0 : index
    %3 = vector.load %arg8[%c0, %c0_1] : memref<64x128xf32, #tpu.memory_space<vmem>>, vector<64x128xf32>
    %c0_2 = arith.constant 0 : index
    %c0_3 = arith.constant 0 : index
    %4 = vector.load %arg4[%c0_2, %c0_3] : memref<64x128xbf16, #tpu.memory_space<vmem>>, vector<64x128xbf16>
    %c0_4 = arith.constant 0 : index
    %c0_5 = arith.constant 0 : index
    %c0_6 = arith.constant 0 : index
    %5 = vector.load %arg5[%c0_4, %c0_5, %c0_6] : memref<1x128x128xbf16, #tpu.memory_space<vmem>>, vector<1x128x128xbf16>
    %6 = vector.shape_cast %5 : vector<1x128x128xbf16> to vector<128x128xbf16>
    %cst = arith.constant dense<0.000000e+00> : vector<64x128xf32>
    %7 = tpu.matmul %4, %6, %cst {dimension_numbers = #tpu.dot_dimension_numbers<[1], [0], [0], [1], [0, 0, 1, 1], [], []>} : vector<64x128xbf16>, vector<128x128xbf16>, vector<64x128xf32> -> vector<64x128xf32>
    %8 = arith.addf %3, %7 : vector<64x128xf32>
    %c0_7 = arith.constant 0 : index
    %c0_8 = arith.constant 0 : index
    %9 = vector.load %arg8[%c0_7, %c0_8] : memref<64x128xf32, #tpu.memory_space<vmem>>, vector<64x128xf32>
    tpu.vector_store %arg8[%c0_7, %c0_8], %8 {strides = array<i32>} : memref<64x128xf32, #tpu.memory_space<vmem>>, vector<64x128xf32>,
    %c0_i32_9 = arith.constant 0 : i32
    %10 = arith.cmpi eq, %arg3, %c0_i32_9 : i32
    %11 = arith.extui %10 : i1 to i32
    %c0_i32_10 = arith.constant 0 : i32
    %12 = arith.cmpi ne, %11, %c0_i32_10 : i32
    scf.if %12 {
      %c0_11 = arith.constant 0 : index
      %c0_12 = arith.constant 0 : index
      %13 = vector.load %arg8[%c0_11, %c0_12] : memref<64x128xf32, #tpu.memory_space<vmem>>, vector<64x128xf32>
      %c0_13 = arith.constant 0 : index
      %c0_14 = arith.constant 0 : index
      %c0_15 = arith.constant 0 : index
      %14 = vector.load %arg6[%c0_13, %c0_14, %c0_15] : memref<1x1x128xf32, #tpu.memory_space<vmem>>, vector<1x1x128xf32>
      %15 = vector.shape_cast %14 : vector<1x1x128xf32> to vector<1x128xf32>
      %16 = vector.broadcast %15 : vector<1x128xf32> to vector<64x128xf32>
      %17 = arith.addf %13, %16 : vector<64x128xf32>
      %18 = arith.truncf %17 : vector<64x128xf32> to vector<64x128xbf16>
      %c0_16 = arith.constant 0 : index
      %c0_17 = arith.constant 0 : index
      %c0_18 = arith.constant 0 : index
      %19 = vector.load %arg7[%c0_16, %c0_17, %c0_18] : memref<1x64x128xbf16, #tpu.memory_space<vmem>>, vector<1x64x128xbf16>
      %20 = vector.shape_cast %19 : vector<1x64x128xbf16> to vector<64x128xbf16>
      %21 = vector.shape_cast %18 : vector<64x128xbf16> to vector<1x64x128xbf16>
      tpu.vector_store %arg7[%c0_16, %c0_17, %c0_18], %21 {strides = array<i32>} : memref<1x64x128xbf16, #tpu.memory_space<vmem>>, vector<1x64x128xbf16>,
    } else {
    }
    return
  }
  func.func @transform_0(%arg0: i32, %arg1: i32, %arg2: i32, %arg3: i32) -> (i32, i32) {
    %c0_i32 = arith.constant 0 : i32
    return %arg1, %arg3 : i32, i32
  }
  func.func @transform_1(%arg0: i32, %arg1: i32, %arg2: i32, %arg3: i32) -> (i32, i32, i32) {
    %c0_i32 = arith.constant 0 : i32
    return %arg0, %arg3, %arg2 : i32, i32, i32
  }
  func.func @transform_2(%arg0: i32, %arg1: i32, %arg2: i32, %arg3: i32) -> (i32, i32, i32) {
    %c0_i32 = arith.constant 0 : i32
    %c0_i32_0 = arith.constant 0 : i32
    return %arg0, %c0_i32, %arg2 : i32, i32, i32
  }
  func.func @transform_3(%arg0: i32, %arg1: i32, %arg2: i32, %arg3: i32) -> (i32, i32, i32) {
    %c0_i32 = arith.constant 0 : i32
    return %arg0, %arg1, %arg2 : i32, i32, i32
  }
}

</mosaic_0001>

<bundles_post_ra>
// kernel: tpu_custom_call.1
= control target key start
LH: loop header
LB: loop body
LE: loop exit
PB: predicated region body
PF: predicated region fallthrough
CT: control target
= control target key end

     0   :  { %8 = vsyncpa [#allocation4], 0  ;;  %s1243_s0 = inlined_call_operand.hbm [shape: bf16[64,128], index: 0, kind: input, shape index: {}]   ;;  %s1244_s1 = inlined_call_operand.hbm [shape: bf16[2,128,128], index: 1, kind: input, shape index: {}]   ;;  %s1245_s2 = inlined_call_operand.hbm [shape: f32[2,1,128], index: 2, kind: input, shape index: {}]   ;;  %s1246_s3 = inlined_call_operand.hbm [shape: bf16[2,64,128], index: 3, kind: output, shape index: {}]  }
   0x1   :  { %9 = vsyncpa [#allocation7], 0 }
   0x2   :  { %11 = vsyncpa [#allocation7 + $0x1], 0 }
   0x3   :  { %12 = vsyncpa [#allocation5], 0 }
   0x4   :  { %14 = vsyncpa [#allocation5 + $0x1], 0  ;;  %s1053_s12 = smov 0   ;;  %s1055_s13 = smov 0  }
   0x5   :  { %s1057_s14 = smov 0   ;;  %s1059_s15 = smov 0  }
   0x6   :  { %s1061_s16 = smov 0   ;;  %s1063_s17 = smov 0  }
   0x7 LB: > { %s46_s18 = sadd.s32 1, %s1022_s16  ;;  %s85_s19 = sadd.s32 1, %s1014_s14  ;;  %s1026_s17 = sphi %s1063_s17, %s20_s17   ;;  %s1022_s16 = sphi %s1061_s16, %s1257_s16   ;;  %s1018_s15 = sphi %s1059_s15, %s1256_s15   ;;  %s1014_s14 = sphi %s1057_s14, %s1255_s14   ;;  %s1010_s13 = sphi %s1055_s13, %s1254_s13   ;;  %s1006_s12 = sphi %s1053_s12, %s1253_s12  }
   0x8   : > { %p48_p0 = scmp.ge.s32.totalorder %s46_s18, 2  ;;  %p92_p1 = scmp.ne.s32.totalorder %s1014_s14, %s1010_s13 }
   0x9   : > { %p93_p2 = scmp.eq.s32.totalorder %s1026_s17, 0  ;;  %p645_p4 = scmp.ge.s32.totalorder %s1026_s17, 2 }
   0xa   : > { %s1259_s18 = smov (%p48_p0, %s46_s18), 0  ;;  %p793_p6 = scmp.lt.s32.totalorder %s1026_s17, 2 }
   0xb   : > { %p1093_p3 = por %p93_p2, %p92_p1  ;;  %s78_s21 = ssub.s32 %s1022_s16, %s1259_s18 }
   0xc   : > { %p83_p5 = scmp.eq.s32.totalorder %s78_s21, 0  ;;  %s198_s22 = sand.u32 1, %s1026_s17  }
   0xd   : > { %s200_s23 = sand.u32 1, %s1014_s14   ;;  %s706_s26 = sshll.u32 %s1022_s16, 6 }
   0xe   : > { %s1104_s24 = scalar_select %p83_p5, %s1014_s14, %s85_s19  }
   0xf   : > { %s646_s25 = sshll.u32 %s200_s23, 6  ;;  %s210_s29 = scalar_lea.hbm %s1244_s1, %s706_s26 }
  0x10   : > { %s202_s30 = scalar_lea.vmem [#allocation6], %s646_s25  ;;  %s211_s5 = sshll.u32 %s210_s29, 4  ;;  %s212_s5 = int_to_ptr.hbm [resolvable:$true] %s211_s5 }
  0x11   : > { %s213_s4 = sshll.u32 %s202_s30, 4  ;;  %p1114_p7 = pnand %p793_p6, %p1093_p3  ;;  %s214_s4 = int_to_ptr.vmem [resolvable:$true] %s213_s4 }
  0x12   : > { %s1118_s7 = scalar_lea.sflag [#allocation7], %s198_s22  ;;  %s1028_s8 = smov 64  }
  0x13   : > { %s1029_s9 = smov 4   ;;  %s1127_s10 = sadd.s32 4294967295, %s1026_s17  }
  0x14   : > { %784 = dma.hbm_to_vmem [thread:$0]  (!%p1114_p7), %s212_s5, 1024, %s214_s4, %s1118_s7, %s1028_s8, %s1028_s8, %s1029_s9  }
  0x15   : > { %s642_s11 = sadd.s32 4294967294, %s1026_s17   ;;  %p98_p8 = scmp.ne.s32.totalorder %s1010_s13, %s1006_s12 }
  0x16   : > { %p99_p9 = scmp.eq.s32.totalorder %s1127_s10, 0  ;;  %p154_p10 = scmp.eq.s32.totalorder %s1127_s10, 1 }
  0x17   : > { %p160_p11 = scmp.eq.s32.totalorder %s642_s11, 1  ;;  %p643_p12 = scmp.ge.s32.totalorder %s1026_s17, 1 }
  0x18   : > { %p1137_p13 = por %p99_p9, %p98_p8  ;;  %p1144_p0 = por %p154_p10, %p92_p1 }
  0x19   : > { %p1148_p2 = por %p160_p11, %p98_p8  ;;  %p167_p3 = scmp.lt.s32.totalorder %s1026_s17, 3 }
  0x1a   : > { %s182_s26 = sshll.u32 %s1243_s0, 4  ;;  %s1030_s28 = smov [#allocation3]   ;;  %s183_s26 = int_to_ptr.hbm [resolvable:$true] %s182_s26 }
  0x1b   : > { %p1156_p5 = pnand %p643_p12, %p167_p3  ;;  %s184_s29 = sshll.u32 %s1030_s28, 4  ;;  %s185_s29 = int_to_ptr.vmem [resolvable:$true] %s184_s29 }
  0x1c   : > { %s230_s5 = scalar_lea.hbm %s1245_s2, %s1022_s16  ;;  %s226_s22 = scalar_lea.vmem [#allocation8], %s200_s23 }
  0x1d   : > { %p777_p1 = pneg %p1156_p5  ;;  %s232_s11 = sshll.u32 %s230_s5, 4  ;;  %s233_s11 = int_to_ptr.hbm [resolvable:$true] %s232_s11 }
  0x1e   : > { %s234_s25 = sshll.u32 %s226_s22, 4  ;;  %243 = sbr.rel (%p1156_p5) target bundleno = 222 (0xde), region = 32  ;;  %s235_s25 = int_to_ptr.vmem [resolvable:$true] %s234_s25 }
  0x1f   : > { %p778_p6 = pnand %p777_p1, %p99_p9 }
  0x20   : > { %787 = dma.hbm_to_vmem [thread:$0]  (!%p1114_p7), %s233_s11, 16, %s235_s25, %s1118_s7  }
  0x21   : > { %780 = dma.hbm_to_vmem [thread:$0]  (!%p778_p6), %s183_s26, 512, %s185_s29, [#allocation4], %s1028_s8, %s1028_s8, %s1029_s9  }
  0x23   : > { %993 = dma.done.wait (%p99_p9), [#allocation4], 512  }
  0x24   : > { %995 = vsyncadd (%p99_p9), [#allocation4], 4294966784  ;;  %s250_s23 = sand.u32 1, %s1127_s10   ;;  %s1184_s28 = sand.u32 1, %s1010_s13  }
  0x25   : > { %s651_s30 = sshll.u32 %s1184_s28, 6  ;;  %s251_s8 = scalar_lea.sflag [#allocation7], %s250_s23 }
  0x26   : > { %s1187_s6 = scalar_lea.vmem [#allocation6], %s651_s30 }
  0x27   : > { %997 = dma.done.wait (%p1137_p13), %s251_s8, 1040  }
  0x28   : > { %999 = vsyncadd (%p1137_p13), %s251_s8, 4294966256  ;;  %v718_v0 = vld [vmem:[%s1187_s6 + $0x38] sm:$0xff]  ;;  %v717_v1 = vld [vmem:[%s1187_s6 + $0x30] sm:$0xff]  ;;  %s263_s7 = scalar_lea.vmem [#allocation8], %s1184_s28  ;;  %s652_s9 = sshll.u32 %s1184_s28, 5 }
  0x29   : > { %410 = vmatpush.bf16.msra.mxu0 %v718_v0  ;;  %743 = vmatpush.bf16.msra.mxu1 %v718_v0  ;;  %v716_v2 = vld [vmem:[%s1187_s6 + $0x28] sm:$0xff]  ;;  %v715_v3 = vld [vmem:[%s1187_s6 + $0x20] sm:$0xff]  ;;  %v714_v4 = vld [vmem:[%s1187_s6 + $0x18] sm:$0xff]  ;;  %s719_s10 = sshll.u32 %s1018_s15, 5  ;;  %s290_s29 = scalar_lea.vmem [#allocation9], %s652_s9 }
  0x2a   : > { %744 = vmatpush.bf16.msra.mxu2 %v718_v0  ;;  %745 = vmatpush.bf16.msra.mxu3 %v718_v0  ;;  %v713_v5 = vld [vmem:[%s1187_s6 + $0x10] sm:$0xff]  ;;  %v712_v6 = vld [vmem:[%s1187_s6 + $0x8] sm:$0xff]  ;;  %v711_v7 = vld [vmem:[%s1187_s6] sm:$0xff]  ;;  %s509_s27 = scalar_lea.hbm %s1246_s3, %s719_s10  ;;  %s510_s4 = sshll.u32 %s290_s29, 4  ;;  %s511_s4 = int_to_ptr.vmem [resolvable:$true] %s510_s4 }
  0x2b   : > { %v707_v8 = vld [vmem:[#allocation3] sm:$0xff]  ;;  %v708_v9 = vld [vmem:[#allocation3 + $0x8] sm:$0xff]  ;;  %v709_v10 = vld [vmem:[#allocation3 + $0x10] sm:$0xff]  ;;  %s512_s5 = sshll.u32 %s509_s27, 4  ;;  %s495_s15 = scalar_lea.sflag [#allocation5], %s1184_s28  ;;  %s513_s5 = int_to_ptr.hbm [resolvable:$true] %s512_s5 }
  0x2c   : > { %v710_v11 = vld [vmem:[#allocation3 + $0x18] sm:$0xff]  ;;  %v849_v14 = vld [vmem:[%s263_s7] ss:$0 sm:$0xff]  ;;  %s954_s11 = sshra.s32 %s513_s5, 4  ;;  %s960_s30 = scalar_lea.hbm %s1246_s3, 64  ;;  %s955_s11 = int_to_ptr.hbm [resolvable:$true] %s954_s11 }
  0x2d   : > { %411 = vmatpush.bf16.msra.mxu0 %v717_v1  ;;  %746 = vmatpush.bf16.msra.mxu1 %v717_v1  ;;  %s956_s22 = scalar_lea.hbm %s955_s11, 32  ;;  %p961_p10 = scmp.lt.s32.totalorder %s955_s11, %s1246_s3 }
  0x2e   : > { %747 = vmatpush.bf16.msra.mxu2 %v717_v1  ;;  %748 = vmatpush.bf16.msra.mxu3 %v717_v1  ;;  %p957_p7 = scmp.ne.s32.totalorder %s955_s11, %s956_s22  ;;  %p962_p11 = scmp.lt.s32.totalorder %s960_s30, %s956_s22 }
  0x30   : > { %p958_p8 = pnand %p957_p7, %p1144_p0  ;;  %p963_p12 = por %p962_p11, %p961_p10 }
  0x31   : > { %412 = vmatpush.bf16.msra.mxu0 %v716_v2  ;;  %749 = vmatpush.bf16.msra.mxu1 %v716_v2 }
  0x32   : > { %750 = vmatpush.bf16.msra.mxu2 %v716_v2  ;;  %751 = vmatpush.bf16.msra.mxu3 %v716_v2  ;;  %p959_p9 = pneg %p958_p8 }
  0x34   : > { %p964_p13 = pnand %p963_p12, %p959_p9 }
  0x35   : > { %413 = vmatpush.bf16.msra.mxu0 %v715_v3  ;;  %752 = vmatpush.bf16.msra.mxu1 %v715_v3 }
  0x36   : > { %753 = vmatpush.bf16.msra.mxu2 %v715_v3  ;;  %754 = vmatpush.bf16.msra.mxu3 %v715_v3 }
  0x39   : > { %414 = vmatpush.bf16.msra.mxu0 %v714_v4  ;;  %755 = vmatpush.bf16.msra.mxu1 %v714_v4 }
  0x3a   : > { %756 = vmatpush.bf16.msra.mxu2 %v714_v4  ;;  %757 = vmatpush.bf16.msra.mxu3 %v714_v4 }
  0x3d   : > { %415 = vmatpush.bf16.msra.mxu0 %v713_v5  ;;  %758 = vmatpush.bf16.msra.mxu1 %v713_v5 }
  0x3e   : > { %759 = vmatpush.bf16.msra.mxu2 %v713_v5  ;;  %760 = vmatpush.bf16.msra.mxu3 %v713_v5 }
  0x41   : > { %416 = vmatpush.bf16.msra.mxu0 %v712_v6  ;;  %761 = vmatpush.bf16.msra.mxu1 %v712_v6 }
  0x42   : > { %762 = vmatpush.bf16.msra.mxu2 %v712_v6  ;;  %763 = vmatpush.bf16.msra.mxu3 %v712_v6 }
  0x45   : > { %417 = vmatpush.bf16.msra.mxu0 %v711_v7  ;;  %764 = vmatpush.bf16.msra.mxu1 %v711_v7 }
  0x46   : > { %765 = vmatpush.bf16.msra.mxu2 %v711_v7  ;;  %766 = vmatpush.bf16.msra.mxu3 %v711_v7 }
  0x48   : > { %418 = vmatmul.bf16.vlgmr.msra.gmra.mxu0 %v707_v8  ;;  %423 = vmatmul.bf16.vlgmr.msra.gmra.mxu1 %v708_v9 }
  0x49   : > { %428 = vmatmul.bf16.vlgmr.msra.gmra.mxu2 %v709_v10  ;;  %433 = vmatmul.bf16.vlgmr.msra.gmra.mxu3 %v710_v11 }
  0xc5   : > { %v419_v12 = vpop.f32.mrf.mxu0  ;;  %v424_v13 = vpop.f32.mrf.mxu1 }
  0xc6   : > { %v470_v19 = vadd.f32 %v849_v14, %v419_v12  ;;  %v472_v20 = vadd.f32 %v849_v14, %v424_v13 }
  0xcc   : > { %v429_v15 = vpop.f32.mrf.mxu2  ;;  %v434_v16 = vpop.f32.mrf.mxu3 }
  0xcd   : > { %v421_v17 = vpop.f32.mrf.mxu0  ;;  %v426_v18 = vpop.f32.mrf.mxu1  ;;  %v474_v27 = vadd.f32 %v849_v14, %v429_v15  ;;  %v476_v28 = vadd.f32 %v849_v14, %v434_v16 }
  0xce   : > { %v471_v21 = vadd.f32 %v849_v14, %v421_v17  ;;  %v473_v22 = vadd.f32 %v849_v14, %v426_v18 }
  0xd0   : > { %v723_v23 = vpack.c.bf16 %v471_v21, %v470_v19  ;;  %v728_v24 = vpack.c.bf16 %v473_v22, %v472_v20 }
  0xd2   : > { %724 = vst [vmem:[%s290_s29] sm:$0xff] %v723_v23  }
  0xd3   : > { %740 = vst [vmem:[%s290_s29 + $0x8] sm:$0xff] %v728_v24  }
  0xd4   : > { %v431_v25 = vpop.f32.mrf.mxu2  ;;  %v436_v26 = vpop.f32.mrf.mxu3 }
  0xd5   : > { %v475_v29 = vadd.f32 %v849_v14, %v431_v25  ;;  %v477_v30 = vadd.f32 %v849_v14, %v436_v26 }
  0xd7   : > { %v733_v31 = vpack.c.bf16 %v475_v29, %v474_v27  ;;  %v738_v32 = vpack.c.bf16 %v477_v30, %v476_v28 }
  0xd9   : > { %741 = vst [vmem:[%s290_s29 + $0x10] sm:$0xff] %v733_v31  }
  0xda   : > { %742 = vst [vmem:[%s290_s29 + $0x18] sm:$0xff] %v738_v32  }
  0xdb   : > { %967 = shalt.err (!%p964_p13)
}
  0xdc   : > { %s1031_s28 = smov 64   ;;  %s1032_s7 = smov 4  }
  0xdd   : > { %775 = dma.vmem_to_hbm [thread:$0]  (%p1144_p0), %s511_s4, 512, %s513_s5, %s495_s15, %s1031_s28, %s1031_s28, %s1032_s7  }
  0xde PF: > { %s527_s9 = sand.u32 1, %s1006_s12   ;;  %p789_p3 = pnand %p645_p4, %p1148_p2 }
  0xdf   : > { %s528_s10 = scalar_lea.sflag [#allocation5], %s527_s9 }
  0xe0   : > { %p790_p5 = pneg %p789_p3 }
  0xe2   : > { %1001 = dma.done.wait (%p790_p5), %s528_s10, 512  }
  0xe3   : > { %1003 = vsyncadd (%p790_p5), %s528_s10, 4294966784  ;;  %s20_s17 = sadd.s32 1, %s1026_s17   ;;  %s1253_s12 = smov %s1010_s13 }
  0xe4   : > { %p17_p1 = scmp.ge.s32.totalorder %s20_s17, 4   ;;  %s1254_s13 = smov %s1014_s14 }
  0xe5   : > { %s1255_s14 = smov %s1104_s24  ;;  %s1256_s15 = smov %s1022_s16 }
  0xe6   : > { %s1257_s16 = smov %s1259_s18  ;;  %19 = sbr.rel (!%p17_p1) target bundleno = 7 (0x7), region = 102 }
  0xeb   :  { %534 = vsyncpa [#allocation4], 1 }
  0xec   :  { %536 = vsyncpa [#allocation4 + $0x1], 1 }
  0xed   :  { %537 = vsyncpa [#allocation7], 1 }
  0xee   :  { %539 = vsyncpa [#allocation7 + $0x1], 1 }
  0xef   :  { %540 = vsyncpa [#allocation5], 1 }
  0xf0   :  { %542 = vsyncpa [#allocation5 + $0x1], 1 }

</bundles_post_ra>
